<compile_context>
chip_gen: v7x
topology: tpu7x:2x2x1
jax: 0.10.0
libtpu: 0.0.40
codegen_flags: <defaults>
</compile_context>

<pallas_src>
import jax
import jax.numpy as jnp
from jax.experimental import pallas as pl
from jax.experimental.pallas import tpu as pltpu


def _round_up(x, m):
    return ((x + m - 1) // m) * m


def stem_kernel(p_ref, w_ref, b_ref, o_ref):
    """Fused conv-as-matmul (BN scale pre-folded into weights) + bias + ReLU.

    f32 accumulate + f32 epilogue; bf16 only at the final store.
    """
    acc = jnp.dot(p_ref[...], w_ref[...], preferred_element_type=jnp.float32)
    o_ref[...] = jnp.maximum(acc + b_ref[...], 0.0).astype(o_ref.dtype)


def _regnet_forward_impl(x_nchw, params):
    """Replicates RegNet.forward: returns (stem_output,) == hidden_states[0:1]."""
    w = params["conv_w"]            # (Cout, Cin, KH, KW), PyTorch layout
    gamma = params["bn_gamma"]
    beta = params["bn_beta"]
    mean = params["bn_mean"]
    var = params["bn_var"]
    eps = params["bn_eps"]

    N, Cin, H, W = x_nchw.shape
    Cout, _, KH, KW = w.shape
    stride, pad = 2, 1
    OH = (H + 2 * pad - KH) // stride + 1
    OW = (W + 2 * pad - KW) // stride + 1
    K = KH * KW * Cin
    M = N * OH * OW

    # ---- im2col (fused by XLA under jit into the copy feeding the kernel) ----
    x_nhwc = jnp.transpose(x_nchw, (0, 2, 3, 1)).astype(jnp.bfloat16)
    xp = jnp.pad(x_nhwc, ((0, 0), (pad, pad), (pad, pad), (0, 0)))
    cols = []
    for dy in range(KH):
        for dx in range(KW):
            cols.append(xp[:, dy:dy + stride * OH:stride,
                           dx:dx + stride * OW:stride, :])
    # last-axis order: (dy, dx, cin)
    patches = jnp.concatenate(cols, axis=-1).reshape(M, K)

    # pad contraction dim to a whole bf16 sublane pack (27 -> 32); zero columns
    KP = _round_up(K, 16)
    if KP != K:
        patches = jnp.pad(patches, ((0, 0), (0, KP - K)))

    # ---- weights: (Cout,Cin,KH,KW) -> (K, Cout), fold BN (eval) scale in ----
    inv_std = 1.0 / jnp.sqrt(var.astype(jnp.float32) + eps)
    scale = gamma.astype(jnp.float32) * inv_std                  # (Cout,)
    bias = beta.astype(jnp.float32) - mean.astype(jnp.float32) * scale

    wmat = jnp.transpose(w, (2, 3, 1, 0)).reshape(K, Cout).astype(jnp.float32)
    wmat = wmat * scale[None, :]                                 # BN scale folded

    # lane-dense output: pad channel dim to 128 (zero columns); zero rows for KP
    CoutP = _round_up(max(Cout, 128), 128)
    wmat = jnp.pad(wmat, ((0, KP - K), (0, CoutP - Cout))).astype(jnp.bfloat16)
    bias_p = jnp.pad(bias, (0, CoutP - Cout)).reshape(1, CoutP).astype(jnp.float32)

    # ---- M tiling ----
    # Small M: single grid step (everything fits one VMEM tile).
    # Large M: 2048-row tiles, padded grid kept EVEN so v7x's 2 TensorCores
    # both get work on the "parallel" axis (no-op on v5e/v6e).
    if M <= 1024:
        tm = _round_up(M, 16)          # bf16 sublane packing alignment
        Mp = tm
    else:
        tm = 2048
        Mp = _round_up(M, 2 * tm)
    if Mp != M:
        patches = jnp.pad(patches, ((0, Mp - M), (0, 0)))

    grid_m = Mp // tm
    flops = 2 * Mp * KP * CoutP
    bytes_accessed = (Mp * KP * 2          # patches (bf16)
                      + KP * CoutP * 2     # weights (bf16)
                      + CoutP * 4          # bias (f32)
                      + Mp * CoutP * 2)    # output (bf16)

    out = pl.pallas_call(
        stem_kernel,
        out_shape=jax.ShapeDtypeStruct((Mp, CoutP), jnp.bfloat16),
        grid=(grid_m,),
        in_specs=[
            pl.BlockSpec((tm, KP), lambda i: (i, 0)),     # patch tile (bf16)
            pl.BlockSpec((KP, CoutP), lambda i: (0, 0)),  # BN-folded weights (bf16)
            pl.BlockSpec((1, CoutP), lambda i: (0, 0)),   # BN bias (f32)
        ],
        out_specs=pl.BlockSpec((tm, CoutP), lambda i: (i, 0)),
        compiler_params=pltpu.CompilerParams(
            dimension_semantics=("parallel",),
            vmem_limit_bytes=32 << 20),
        cost_estimate=pl.CostEstimate(
            flops=flops, transcendentals=0, bytes_accessed=bytes_accessed),
    )(patches, wmat, bias_p)

    # drop padding, back to NCHW (still bf16 → half the transpose traffic),
    # upcast to f32 only at the very end to preserve the f32 interface.
    y = out[:M, :Cout].reshape(N, OH, OW, Cout).transpose(0, 3, 1, 2)
    y = y.astype(jnp.float32)
    return (y,)   # tuple, == hidden_states[0:1]


regnet_forward = jax.jit(_regnet_forward_impl)


def init_params(key, cin=3, cout=32, k=3):
    """Deterministic synthetic parameters with the shapes RegNet's stem uses."""
    k_w, k_g, k_b, k_m, k_v = jax.random.split(key, 5)
    fan_in = cin * k * k
    conv_w = jax.random.normal(k_w, (cout, cin, k, k), jnp.float32) * (2.0 / fan_in) ** 0.5
    return {
        "conv_w": conv_w,
        "bn_gamma": 1.0 + 0.1 * jax.random.normal(k_g, (cout,), jnp.float32),
        "bn_beta": 0.1 * jax.random.normal(k_b, (cout,), jnp.float32),
        "bn_mean": 0.05 * jax.random.normal(k_m, (cout,), jnp.float32),
        "bn_var": 1.0 + jnp.abs(0.1 * jax.random.normal(k_v, (cout,), jnp.float32)),
        "bn_eps": 1e-5,
    }


if __name__ == "__main__":
    key = jax.random.PRNGKey(0)
    k_x, k_p = jax.random.split(key)

    # RegNet is an image backbone with 3 input channels (NCHW like PyTorch).
    x = jax.random.normal(k_x, (2, 3, 32, 32), jnp.float32)
    params = init_params(k_p)

    out = regnet_forward(x, params)
    out = jax.block_until_ready(out)

    # sanity: tuple of one hidden state, shape (N, 32, H/2, W/2), ReLU'ed
    assert isinstance(out, tuple) and len(out) == 1
    assert out[0].shape == (2, 32, 16, 16)
    assert out[0].dtype == jnp.float32
    assert bool(jnp.all(out[0] >= 0.0))

    # quick numerical check against a pure-JAX f32 reference of the same math
    def ref(x_nchw, p):
        w, g, b, m, v, eps = (p["conv_w"], p["bn_gamma"], p["bn_beta"],
                              p["bn_mean"], p["bn_var"], p["bn_eps"])
        y = jax.lax.conv_general_dilated(
            x_nchw, w, window_strides=(2, 2), padding=((1, 1), (1, 1)),
            dimension_numbers=("NCHW", "OIHW", "NCHW"))
        s = g / jnp.sqrt(v + eps)
        y = y * s[None, :, None, None] + (b - m * s)[None, :, None, None]
        return jnp.maximum(y, 0.0)

    r = ref(x, params)
    err = float(jnp.max(jnp.abs(out[0] - r)) / (jnp.max(jnp.abs(r)) + 1e-6))
    assert err < 5e-2, f"relative error too large: {err}"   # bf16 operands + bf16 store

    print("KERNEL_OK")
</pallas_src>

<mosaic_0001>
module attributes {stable_mosaic.version = 11 : i64} {
  func.func @stem_kernel(%arg0: i32, %arg1: memref<512x32xbf16, #tpu.memory_space<vmem>>, %arg2: memref<32x128xbf16, #tpu.memory_space<vmem>>, %arg3: memref<1x128xf32, #tpu.memory_space<vmem>>, %arg4: memref<512x128xbf16, #tpu.memory_space<vmem>>) attributes {dimension_semantics = [#tpu.dimension_semantics<parallel>], iteration_bounds = array<i64: 1>, scalar_prefetch = 0 : i64, scratch_operands = 0 : i64, tpu.core_type = #tpu.core_type<tc>, window_params = [{transform_indices = @transform_0, window_bounds = array<i64: 512, 32>}, {pipeline_mode = #tpu.pipeline_mode<synchronous>, transform_indices = @transform_1, window_bounds = array<i64: 32, 128>}, {pipeline_mode = #tpu.pipeline_mode<synchronous>, transform_indices = @transform_2, window_bounds = array<i64: 1, 128>}, {transform_indices = @transform_3, window_bounds = array<i64: 512, 128>}]} {
    %c0 = arith.constant 0 : index
    %c0_0 = arith.constant 0 : index
    %0 = vector.load %arg1[%c0, %c0_0] : memref<512x32xbf16, #tpu.memory_space<vmem>>, vector<512x32xbf16>
    %c0_1 = arith.constant 0 : index
    %c0_2 = arith.constant 0 : index
    %1 = vector.load %arg2[%c0_1, %c0_2] : memref<32x128xbf16, #tpu.memory_space<vmem>>, vector<32x128xbf16>
    %cst = arith.constant dense<0.000000e+00> : vector<512x128xf32>
    %2 = tpu.matmul %0, %1, %cst {dimension_numbers = #tpu.dot_dimension_numbers<[1], [0], [0], [1], [0, 0, 1, 1], [], []>} : vector<512x32xbf16>, vector<32x128xbf16>, vector<512x128xf32> -> vector<512x128xf32>
    %c0_3 = arith.constant 0 : index
    %c0_4 = arith.constant 0 : index
    %3 = vector.load %arg3[%c0_3, %c0_4] : memref<1x128xf32, #tpu.memory_space<vmem>>, vector<1x128xf32>
    %4 = vector.broadcast %3 : vector<1x128xf32> to vector<512x128xf32>
    %5 = arith.addf %2, %4 : vector<512x128xf32>
    %cst_5 = arith.constant 0.000000e+00 : f32
    %6 = vector.broadcast %cst_5 : f32 to vector<512x128xf32>
    %7 = arith.maximumf %5, %6 : vector<512x128xf32>
    %8 = arith.truncf %7 : vector<512x128xf32> to vector<512x128xbf16>
    %c0_6 = arith.constant 0 : index
    %c0_7 = arith.constant 0 : index
    %9 = vector.load %arg4[%c0_6, %c0_7] : memref<512x128xbf16, #tpu.memory_space<vmem>>, vector<512x128xbf16>
    tpu.vector_store %arg4[%c0_6, %c0_7], %8 {strides = array<i32>} : memref<512x128xbf16, #tpu.memory_space<vmem>>, vector<512x128xbf16>,
    return
  }
  func.func @transform_0(%arg0: i32) -> (i32, i32) {
    %c0_i32 = arith.constant 0 : i32
    %c0_i32_0 = arith.constant 0 : i32
    return %arg0, %c0_i32 : i32, i32
  }
  func.func @transform_1(%arg0: i32) -> (i32, i32) {
    %c0_i32 = arith.constant 0 : i32
    %c0_i32_0 = arith.constant 0 : i32
    %c0_i32_1 = arith.constant 0 : i32
    return %c0_i32, %c0_i32_0 : i32, i32
  }
  func.func @transform_2(%arg0: i32) -> (i32, i32) {
    %c0_i32 = arith.constant 0 : i32
    %c0_i32_0 = arith.constant 0 : i32
    %c0_i32_1 = arith.constant 0 : i32
    return %c0_i32, %c0_i32_0 : i32, i32
  }
  func.func @transform_3(%arg0: i32) -> (i32, i32) {
    %c0_i32 = arith.constant 0 : i32
    %c0_i32_0 = arith.constant 0 : i32
    return %arg0, %c0_i32 : i32, i32
  }
}

</mosaic_0001>

<bundles_post_ra>
// kernel: _regnet_forward_impl.1
= control target key start
LH: loop header
LB: loop body
LE: loop exit
PB: predicated region body
PF: predicated region fallthrough
CT: control target
= control target key end

     0   :  { %vm262_vm0 = vcmask 261120   ;;  %s1881_s1 = inlined_call_operand.vmem [shape: bf16[32,128], index: 1, kind: input, shape index: {}]   ;;  %s1882_s0 = inlined_call_operand.vmem [shape: bf16[512,32], index: 0, kind: input, shape index: {}]   ;;  %s1883_s2 = inlined_call_operand.vmem [shape: f32[1,128], index: 2, kind: input, shape index: {}]   ;;  %s1884_s3 = inlined_call_operand.vmem [shape: bf16[512,128], index: 3, kind: output, shape index: {}]  }
   0x1   :  { %v1528_v0 = vld [vmem:[%s1881_s1] sm:$0xff]   ;;  %v1529_v1 = vld [vmem:[%s1881_s1 + $0x8] sm:$0xff]   ;;  %v1534_v6 = vld [vmem:[%s1882_s0 + $0x10] sm:$0xff]  }
   0x2   :  { %1456 = vmatprep.subr.bf16.mxu0 %v1528_v0  ;;  %1524 = vmatprep.subr.bf16.mxu1 %v1528_v0  ;;  %v1530_v2 = vld [vmem:[%s1882_s0] sm:$0xff]   ;;  %v1532_v4 = vld [vmem:[%s1882_s0 + $0x8] sm:$0xff]   ;;  %v1535_v7 = vld [vmem:[%s1882_s0 + $0x90] sm:$0xff]  }
   0x3   :  { %1457 = vmatpush3.bf16.msra.mxu0 %v1528_v0  ;;  %1526 = vmatpush3.bf16.msra.mxu1 %v1528_v0  ;;  %v1531_v3 = vld [vmem:[%s1882_s0 + $0x80] sm:$0xff]   ;;  %v1533_v5 = vld [vmem:[%s1882_s0 + $0x88] sm:$0xff]   ;;  %v1536_v8 = vld [vmem:[%s1882_s0 + $0x18] sm:$0xff]  }
   0x4   :  { %1458 = vmatprep.subr.bf16.mxu0 %v1529_v1  ;;  %1525 = vmatprep.subr.bf16.mxu1 %v1529_v1  ;;  %v1537_v9 = vld [vmem:[%s1882_s0 + $0x98] sm:$0xff]   ;;  %v1538_v10 = vld [vmem:[%s1882_s0 + $0x20] sm:$0xff]   ;;  %v1540_v12 = vld [vmem:[%s1882_s0 + $0x28] sm:$0xff]  }
   0x5   :  { %1460 = vmatprep.mubr.msk.bf16.mxu0 %vm262_vm0, %v1530_v2  ;;  %1492 = vmatprep.mubr.msk.bf16.mxu1 %vm262_vm0, %v1531_v3  ;;  %v1539_v11 = vld [vmem:[%s1882_s0 + $0xa0] sm:$0xff]   ;;  %v1541_v13 = vld [vmem:[%s1882_s0 + $0xa8] sm:$0xff]   ;;  %v1542_v14 = vld [vmem:[%s1882_s0 + $0x30] sm:$0xff]  }
   0x6   :  { %v1543_v15 = vld [vmem:[%s1882_s0 + $0xb0] sm:$0xff]   ;;  %v1544_v16 = vld [vmem:[%s1882_s0 + $0x38] sm:$0xff]   ;;  %v1546_v18 = vld [vmem:[%s1882_s0 + $0x40] sm:$0xff]  }
   0x7   :  { %1459 = vmatpush3.bf16.msra.mxu0 %v1529_v1  ;;  %1527 = vmatpush3.bf16.msra.mxu1 %v1529_v1  ;;  %v1545_v17 = vld [vmem:[%s1882_s0 + $0xb8] sm:$0xff]   ;;  %v1547_v19 = vld [vmem:[%s1882_s0 + $0xc0] sm:$0xff]   ;;  %v1548_v20 = vld [vmem:[%s1882_s0 + $0x48] sm:$0xff]  }
   0x8   :  { %v1549_v21 = vld [vmem:[%s1882_s0 + $0xc8] sm:$0xff]   ;;  %v1550_v22 = vld [vmem:[%s1882_s0 + $0x50] sm:$0xff]   ;;  %v1552_v24 = vld [vmem:[%s1882_s0 + $0x58] sm:$0xff]  }
   0x9   :  { %v1551_v23 = vld [vmem:[%s1882_s0 + $0xd0] sm:$0xff]   ;;  %v1553_v25 = vld [vmem:[%s1882_s0 + $0xd8] sm:$0xff]   ;;  %v1554_v26 = vld [vmem:[%s1882_s0 + $0x60] sm:$0xff]  }
   0xa   :  { %1461 = vmatmul.mubr.msk.bf16.vlgmr.msra.gmra.mrb[0].mxu0 %vm262_vm0, %v1532_v4  ;;  %1493 = vmatmul.mubr.msk.bf16.vlgmr.msra.gmra.mrb[0].mxu1 %vm262_vm0, %v1533_v5  ;;  %v1555_v27 = vld [vmem:[%s1882_s0 + $0xe0] sm:$0xff]   ;;  %v1556_v28 = vld [vmem:[%s1882_s0 + $0x68] sm:$0xff]   ;;  %v1558_v30 = vld [vmem:[%s1882_s0 + $0x70] sm:$0xff]  }
   0xb   :  { %1464 = vmatprep.mubr.msk.bf16.mxu0 %vm262_vm0, %v1534_v6  ;;  %1496 = vmatprep.mubr.msk.bf16.mxu1 %vm262_vm0, %v1535_v7  ;;  %v1557_v29 = vld [vmem:[%s1882_s0 + $0xe8] sm:$0xff]   ;;  %v1559_v31 = vld [vmem:[%s1882_s0 + $0xf0] sm:$0xff]   ;;  %v1560_v32 = vld [vmem:[%s1882_s0 + $0x78] sm:$0xff]  }
   0xc   :  { %v1561_v33 = vld [vmem:[%s1882_s0 + $0xf8] sm:$0xff]   ;;  %v1719_v34 = vld [vmem:[%s1883_s2] ss:$0 sm:$0xff] }
  0x12   :  { %1465 = vmatmul.mubr.msk.bf16.gmra.mrb[4].mxu0 %vm262_vm0, %v1536_v8  ;;  %1497 = vmatmul.mubr.msk.bf16.gmra.mrb[4].mxu1 %vm262_vm0, %v1537_v9 }
  0x13   :  { %1468 = vmatprep.mubr.msk.bf16.mxu0 %vm262_vm0, %v1538_v10  ;;  %1500 = vmatprep.mubr.msk.bf16.mxu1 %vm262_vm0, %v1539_v11 }
  0x1a   :  { %1469 = vmatmul.mubr.msk.bf16.gmra.mrb[8].mxu0 %vm262_vm0, %v1540_v12  ;;  %1501 = vmatmul.mubr.msk.bf16.gmra.mrb[8].mxu1 %vm262_vm0, %v1541_v13 }
  0x1b   :  { %1472 = vmatprep.mubr.msk.bf16.mxu0 %vm262_vm0, %v1542_v14  ;;  %1504 = vmatprep.mubr.msk.bf16.mxu1 %vm262_vm0, %v1543_v15 }
  0x22   :  { %1473 = vmatmul.mubr.msk.bf16.gmra.mrb[12].mxu0 %vm262_vm0, %v1544_v16  ;;  %1505 = vmatmul.mubr.msk.bf16.gmra.mrb[12].mxu1 %vm262_vm0, %v1545_v17 }
  0x23   :  { %1476 = vmatprep.mubr.msk.bf16.mxu0 %vm262_vm0, %v1546_v18  ;;  %1508 = vmatprep.mubr.msk.bf16.mxu1 %vm262_vm0, %v1547_v19 }
  0x2a   :  { %1477 = vmatmul.mubr.msk.bf16.gmra.mrb[16].mxu0 %vm262_vm0, %v1548_v20  ;;  %1509 = vmatmul.mubr.msk.bf16.gmra.mrb[16].mxu1 %vm262_vm0, %v1549_v21 }
  0x2b   :  { %1480 = vmatprep.mubr.msk.bf16.mxu0 %vm262_vm0, %v1550_v22  ;;  %1512 = vmatprep.mubr.msk.bf16.mxu1 %vm262_vm0, %v1551_v23 }
  0x32   :  { %1481 = vmatmul.mubr.msk.bf16.gmra.mrb[20].mxu0 %vm262_vm0, %v1552_v24  ;;  %1513 = vmatmul.mubr.msk.bf16.gmra.mrb[20].mxu1 %vm262_vm0, %v1553_v25 }
  0x33   :  { %1484 = vmatprep.mubr.msk.bf16.mxu0 %vm262_vm0, %v1554_v26  ;;  %1516 = vmatprep.mubr.msk.bf16.mxu1 %vm262_vm0, %v1555_v27 }
  0x3a   :  { %1485 = vmatmul.mubr.msk.bf16.gmra.mrb[24].mxu0 %vm262_vm0, %v1556_v28  ;;  %1517 = vmatmul.mubr.msk.bf16.gmra.mrb[24].mxu1 %vm262_vm0, %v1557_v29 }
  0x3b   :  { %1488 = vmatprep.mubr.msk.bf16.mxu0 %vm262_vm0, %v1558_v30  ;;  %1520 = vmatprep.mubr.msk.bf16.mxu1 %vm262_vm0, %v1559_v31 }
  0x42   :  { %1489 = vmatmul.mubr.msk.bf16.gmra.mrb[28].mxu0 %vm262_vm0, %v1560_v32  ;;  %1521 = vmatmul.mubr.msk.bf16.gmra.mrb[28].mxu1 %vm262_vm0, %v1561_v33 }
  0xdd   :  { %v1462_v35 = vpop.f32.mrb[0].mxu0  ;;  %v1494_v36 = vpop.f32.mrb[0].mxu1 }
  0xde   :  { %v402_v37 = vadd.f32 %v1462_v35, %v1719_v34  ;;  %v530_v38 = vadd.f32 %v1494_v36, %v1719_v34  ;;  %v393_v39 = vpop.f32.mrb[1].mxu0  ;;  %v521_v40 = vpop.f32.mrb[1].mxu1 }
  0xdf   :  { %v394_v41 = vadd.f32 %v1719_v34, %v393_v39  ;;  %v522_v42 = vadd.f32 %v1719_v34, %v521_v40  ;;  %v1463_v43 = vpop.f32.mrb[2].mxu0  ;;  %v1495_v44 = vpop.f32.mrb[2].mxu1 }
  0xe0   :  { %v405_v45 = vadd.f32 %v1463_v43, %v1719_v34  ;;  %v533_v46 = vadd.f32 %v1495_v44, %v1719_v34  ;;  %v396_v47 = vpop.f32.mrb[3].mxu0  ;;  %v524_v48 = vpop.f32.mrb[3].mxu1  ;;  %v650_v51 = vmax.f32 %v402_v37, 0.0  ;;  %v682_v52 = vmax.f32 %v530_v38, 0.0 }
  0xe1   :  { %v397_v49 = vadd.f32 %v1719_v34, %v396_v47  ;;  %v525_v50 = vadd.f32 %v1719_v34, %v524_v48  ;;  %v648_v55 = vmax.f32 %v394_v41, 0.0  ;;  %v680_v56 = vmax.f32 %v522_v42, 0.0 }
  0xe2   :  { %v651_v53 = vmax.f32 %v405_v45, 0.0  ;;  %v683_v54 = vmax.f32 %v533_v46, 0.0 }
  0xe3   :  { %v649_v57 = vmax.f32 %v397_v49, 0.0  ;;  %v681_v58 = vmax.f32 %v525_v50, 0.0 }
  0xe4   :  { %v1239_v59 = vpack.c.bf16 %v651_v53, %v650_v51  ;;  %v1319_v60 = vpack.c.bf16 %v683_v54, %v682_v52 }
  0xe5   :  { %v1234_v61 = vpack.c.bf16 %v649_v57, %v648_v55  ;;  %v1314_v62 = vpack.c.bf16 %v681_v58, %v680_v56  ;;  %v1466_v63 = vpop.f32.mrb[4].mxu0  ;;  %v1498_v0 = vpop.f32.mrb[4].mxu1 }
  0xe6   :  { %1391 = vst [vmem:[%s1884_s3 + $0x8] sm:$0xff] %v1239_v59   ;;  %1407 = vst [vmem:[%s1884_s3 + $0x88] sm:$0xff] %v1319_v60   ;;  %v418_v1 = vadd.f32 %v1466_v63, %v1719_v34  ;;  %v546_v2 = vadd.f32 %v1498_v0, %v1719_v34  ;;  %v409_v3 = vpop.f32.mrb[5].mxu0  ;;  %v537_v4 = vpop.f32.mrb[5].mxu1 }
  0xe7   :  { %1235 = vst [vmem:[%s1884_s3] sm:$0xff] %v1234_v61   ;;  %1406 = vst [vmem:[%s1884_s3 + $0x80] sm:$0xff] %v1314_v62   ;;  %v410_v5 = vadd.f32 %v1719_v34, %v409_v3  ;;  %v538_v6 = vadd.f32 %v1719_v34, %v537_v4  ;;  %v1467_v7 = vpop.f32.mrb[6].mxu0  ;;  %v1499_v8 = vpop.f32.mrb[6].mxu1 }
  0xe8   :  { %v421_v9 = vadd.f32 %v1467_v7, %v1719_v34  ;;  %v549_v10 = vadd.f32 %v1499_v8, %v1719_v34  ;;  %v412_v11 = vpop.f32.mrb[7].mxu0  ;;  %v540_v12 = vpop.f32.mrb[7].mxu1  ;;  %v654_v15 = vmax.f32 %v418_v1, 0.0  ;;  %v686_v16 = vmax.f32 %v546_v2, 0.0 }
  0xe9   :  { %v413_v13 = vadd.f32 %v1719_v34, %v412_v11  ;;  %v541_v14 = vadd.f32 %v1719_v34, %v540_v12  ;;  %v652_v19 = vmax.f32 %v410_v5, 0.0  ;;  %v684_v20 = vmax.f32 %v538_v6, 0.0 }
  0xea   :  { %v655_v17 = vmax.f32 %v421_v9, 0.0  ;;  %v687_v18 = vmax.f32 %v549_v10, 0.0 }
  0xeb   :  { %v653_v21 = vmax.f32 %v413_v13, 0.0  ;;  %v685_v22 = vmax.f32 %v541_v14, 0.0 }
  0xec   :  { %v1249_v23 = vpack.c.bf16 %v655_v17, %v654_v15  ;;  %v1329_v24 = vpack.c.bf16 %v687_v18, %v686_v16 }
  0xed   :  { %v1244_v25 = vpack.c.bf16 %v653_v21, %v652_v19  ;;  %v1324_v26 = vpack.c.bf16 %v685_v22, %v684_v20  ;;  %v1470_v27 = vpop.f32.mrb[8].mxu0  ;;  %v1502_v28 = vpop.f32.mrb[8].mxu1 }
  0xee   :  { %1393 = vst [vmem:[%s1884_s3 + $0x18] sm:$0xff] %v1249_v23   ;;  %1409 = vst [vmem:[%s1884_s3 + $0x98] sm:$0xff] %v1329_v24   ;;  %v434_v29 = vadd.f32 %v1470_v27, %v1719_v34  ;;  %v562_v30 = vadd.f32 %v1502_v28, %v1719_v34  ;;  %v425_v31 = vpop.f32.mrb[9].mxu0  ;;  %v553_v32 = vpop.f32.mrb[9].mxu1 }
  0xef   :  { %1392 = vst [vmem:[%s1884_s3 + $0x10] sm:$0xff] %v1244_v25   ;;  %1408 = vst [vmem:[%s1884_s3 + $0x90] sm:$0xff] %v1324_v26   ;;  %v426_v33 = vadd.f32 %v1719_v34, %v425_v31  ;;  %v554_v35 = vadd.f32 %v1719_v34, %v553_v32  ;;  %v1471_v36 = vpop.f32.mrb[10].mxu0  ;;  %v1503_v37 = vpop.f32.mrb[10].mxu1 }
  0xf0   :  { %v437_v38 = vadd.f32 %v1471_v36, %v1719_v34  ;;  %v565_v39 = vadd.f32 %v1503_v37, %v1719_v34  ;;  %v428_v40 = vpop.f32.mrb[11].mxu0  ;;  %v556_v41 = vpop.f32.mrb[11].mxu1  ;;  %v658_v44 = vmax.f32 %v434_v29, 0.0  ;;  %v690_v45 = vmax.f32 %v562_v30, 0.0 }
  0xf1   :  { %v429_v42 = vadd.f32 %v1719_v34, %v428_v40  ;;  %v557_v43 = vadd.f32 %v1719_v34, %v556_v41  ;;  %v656_v48 = vmax.f32 %v426_v33, 0.0  ;;  %v688_v49 = vmax.f32 %v554_v35, 0.0 }
  0xf2   :  { %v659_v46 = vmax.f32 %v437_v38, 0.0  ;;  %v691_v47 = vmax.f32 %v565_v39, 0.0 }
  0xf3   :  { %v657_v50 = vmax.f32 %v429_v42, 0.0  ;;  %v689_v51 = vmax.f32 %v557_v43, 0.0 }
  0xf4   :  { %v1259_v52 = vpack.c.bf16 %v659_v46, %v658_v44  ;;  %v1339_v53 = vpack.c.bf16 %v691_v47, %v690_v45 }
  0xf5   :  { %v1254_v54 = vpack.c.bf16 %v657_v50, %v656_v48  ;;  %v1334_v55 = vpack.c.bf16 %v689_v51, %v688_v49  ;;  %v1474_v56 = vpop.f32.mrb[12].mxu0  ;;  %v1506_v57 = vpop.f32.mrb[12].mxu1 }
  0xf6   :  { %1395 = vst [vmem:[%s1884_s3 + $0x28] sm:$0xff] %v1259_v52   ;;  %1411 = vst [vmem:[%s1884_s3 + $0xa8] sm:$0xff] %v1339_v53   ;;  %v450_v58 = vadd.f32 %v1474_v56, %v1719_v34  ;;  %v578_v59 = vadd.f32 %v1506_v57, %v1719_v34  ;;  %v441_v60 = vpop.f32.mrb[13].mxu0  ;;  %v569_v61 = vpop.f32.mrb[13].mxu1 }
  0xf7   :  { %1394 = vst [vmem:[%s1884_s3 + $0x20] sm:$0xff] %v1254_v54   ;;  %1410 = vst [vmem:[%s1884_s3 + $0xa0] sm:$0xff] %v1334_v55   ;;  %v442_v62 = vadd.f32 %v1719_v34, %v441_v60  ;;  %v570_v63 = vadd.f32 %v1719_v34, %v569_v61  ;;  %v1475_v0 = vpop.f32.mrb[14].mxu0  ;;  %v1507_v1 = vpop.f32.mrb[14].mxu1 }
  0xf8   :  { %v453_v2 = vadd.f32 %v1475_v0, %v1719_v34  ;;  %v581_v3 = vadd.f32 %v1507_v1, %v1719_v34  ;;  %v444_v4 = vpop.f32.mrb[15].mxu0  ;;  %v572_v5 = vpop.f32.mrb[15].mxu1  ;;  %v662_v8 = vmax.f32 %v450_v58, 0.0  ;;  %v694_v9 = vmax.f32 %v578_v59, 0.0 }
  0xf9   :  { %v445_v6 = vadd.f32 %v1719_v34, %v444_v4  ;;  %v573_v7 = vadd.f32 %v1719_v34, %v572_v5  ;;  %v660_v12 = vmax.f32 %v442_v62, 0.0  ;;  %v692_v13 = vmax.f32 %v570_v63, 0.0 }
  0xfa   :  { %v663_v10 = vmax.f32 %v453_v2, 0.0  ;;  %v695_v11 = vmax.f32 %v581_v3, 0.0 }
  0xfb   :  { %v661_v14 = vmax.f32 %v445_v6, 0.0  ;;  %v693_v15 = vmax.f32 %v573_v7, 0.0 }
  0xfc   :  { %v1269_v16 = vpack.c.bf16 %v663_v10, %v662_v8  ;;  %v1349_v17 = vpack.c.bf16 %v695_v11, %v694_v9 }
  0xfd   :  { %v1264_v18 = vpack.c.bf16 %v661_v14, %v660_v12  ;;  %v1344_v19 = vpack.c.bf16 %v693_v15, %v692_v13  ;;  %v1478_v20 = vpop.f32.mrb[16].mxu0  ;;  %v1510_v21 = vpop.f32.mrb[16].mxu1 }
  0xfe   :  { %1397 = vst [vmem:[%s1884_s3 + $0x38] sm:$0xff] %v1269_v16   ;;  %1413 = vst [vmem:[%s1884_s3 + $0xb8] sm:$0xff] %v1349_v17   ;;  %v466_v22 = vadd.f32 %v1478_v20, %v1719_v34  ;;  %v594_v23 = vadd.f32 %v1510_v21, %v1719_v34  ;;  %v457_v24 = vpop.f32.mrb[17].mxu0  ;;  %v585_v25 = vpop.f32.mrb[17].mxu1 }
  0xff   :  { %1396 = vst [vmem:[%s1884_s3 + $0x30] sm:$0xff] %v1264_v18   ;;  %1412 = vst [vmem:[%s1884_s3 + $0xb0] sm:$0xff] %v1344_v19   ;;  %v458_v26 = vadd.f32 %v1719_v34, %v457_v24  ;;  %v586_v27 = vadd.f32 %v1719_v34, %v585_v25  ;;  %v1479_v28 = vpop.f32.mrb[18].mxu0  ;;  %v1511_v29 = vpop.f32.mrb[18].mxu1 }
 0x100   :  { %v469_v30 = vadd.f32 %v1479_v28, %v1719_v34  ;;  %v597_v31 = vadd.f32 %v1511_v29, %v1719_v34  ;;  %v460_v32 = vpop.f32.mrb[19].mxu0  ;;  %v588_v33 = vpop.f32.mrb[19].mxu1  ;;  %v666_v37 = vmax.f32 %v466_v22, 0.0  ;;  %v698_v38 = vmax.f32 %v594_v23, 0.0 }
 0x101   :  { %v461_v35 = vadd.f32 %v1719_v34, %v460_v32  ;;  %v589_v36 = vadd.f32 %v1719_v34, %v588_v33  ;;  %v664_v41 = vmax.f32 %v458_v26, 0.0  ;;  %v696_v42 = vmax.f32 %v586_v27, 0.0 }
 0x102   :  { %v667_v39 = vmax.f32 %v469_v30, 0.0  ;;  %v699_v40 = vmax.f32 %v597_v31, 0.0 }
 0x103   :  { %v665_v43 = vmax.f32 %v461_v35, 0.0  ;;  %v697_v44 = vmax.f32 %v589_v36, 0.0 }
 0x104   :  { %v1279_v45 = vpack.c.bf16 %v667_v39, %v666_v37  ;;  %v1359_v46 = vpack.c.bf16 %v699_v40, %v698_v38 }
 0x105   :  { %v1274_v47 = vpack.c.bf16 %v665_v43, %v664_v41  ;;  %v1354_v48 = vpack.c.bf16 %v697_v44, %v696_v42  ;;  %v1482_v49 = vpop.f32.mrb[20].mxu0  ;;  %v1514_v50 = vpop.f32.mrb[20].mxu1 }
 0x106   :  { %1399 = vst [vmem:[%s1884_s3 + $0x48] sm:$0xff] %v1279_v45   ;;  %1415 = vst [vmem:[%s1884_s3 + $0xc8] sm:$0xff] %v1359_v46   ;;  %v482_v51 = vadd.f32 %v1482_v49, %v1719_v34  ;;  %v610_v52 = vadd.f32 %v1514_v50, %v1719_v34  ;;  %v473_v53 = vpop.f32.mrb[21].mxu0  ;;  %v601_v54 = vpop.f32.mrb[21].mxu1 }
 0x107   :  { %1398 = vst [vmem:[%s1884_s3 + $0x40] sm:$0xff] %v1274_v47   ;;  %1414 = vst [vmem:[%s1884_s3 + $0xc0] sm:$0xff] %v1354_v48   ;;  %v474_v55 = vadd.f32 %v1719_v34, %v473_v53  ;;  %v602_v56 = vadd.f32 %v1719_v34, %v601_v54  ;;  %v1483_v57 = vpop.f32.mrb[22].mxu0  ;;  %v1515_v58 = vpop.f32.mrb[22].mxu1 }
 0x108   :  { %v485_v59 = vadd.f32 %v1483_v57, %v1719_v34  ;;  %v613_v60 = vadd.f32 %v1515_v58, %v1719_v34  ;;  %v476_v61 = vpop.f32.mrb[23].mxu0  ;;  %v604_v62 = vpop.f32.mrb[23].mxu1  ;;  %v670_v1 = vmax.f32 %v482_v51, 0.0  ;;  %v702_v2 = vmax.f32 %v610_v52, 0.0 }
 0x109   :  { %v477_v63 = vadd.f32 %v1719_v34, %v476_v61  ;;  %v605_v0 = vadd.f32 %v1719_v34, %v604_v62  ;;  %v668_v5 = vmax.f32 %v474_v55, 0.0  ;;  %v700_v6 = vmax.f32 %v602_v56, 0.0 }
 0x10a   :  { %v671_v3 = vmax.f32 %v485_v59, 0.0  ;;  %v703_v4 = vmax.f32 %v613_v60, 0.0 }
 0x10b   :  { %v669_v7 = vmax.f32 %v477_v63, 0.0  ;;  %v701_v8 = vmax.f32 %v605_v0, 0.0 }
 0x10c   :  { %v1289_v9 = vpack.c.bf16 %v671_v3, %v670_v1  ;;  %v1369_v10 = vpack.c.bf16 %v703_v4, %v702_v2 }
 0x10d   :  { %v1284_v11 = vpack.c.bf16 %v669_v7, %v668_v5  ;;  %v1364_v12 = vpack.c.bf16 %v701_v8, %v700_v6  ;;  %v1486_v13 = vpop.f32.mrb[24].mxu0  ;;  %v1518_v14 = vpop.f32.mrb[24].mxu1 }
 0x10e   :  { %1401 = vst [vmem:[%s1884_s3 + $0x58] sm:$0xff] %v1289_v9   ;;  %1417 = vst [vmem:[%s1884_s3 + $0xd8] sm:$0xff] %v1369_v10   ;;  %v498_v15 = vadd.f32 %v1486_v13, %v1719_v34  ;;  %v626_v16 = vadd.f32 %v1518_v14, %v1719_v34  ;;  %v489_v17 = vpop.f32.mrb[25].mxu0  ;;  %v617_v18 = vpop.f32.mrb[25].mxu1 }
 0x10f   :  { %1400 = vst [vmem:[%s1884_s3 + $0x50] sm:$0xff] %v1284_v11   ;;  %1416 = vst [vmem:[%s1884_s3 + $0xd0] sm:$0xff] %v1364_v12   ;;  %v490_v19 = vadd.f32 %v1719_v34, %v489_v17  ;;  %v618_v20 = vadd.f32 %v1719_v34, %v617_v18  ;;  %v1487_v21 = vpop.f32.mrb[26].mxu0  ;;  %v1519_v22 = vpop.f32.mrb[26].mxu1 }
 0x110   :  { %v501_v23 = vadd.f32 %v1487_v21, %v1719_v34  ;;  %v629_v24 = vadd.f32 %v1519_v22, %v1719_v34  ;;  %v492_v25 = vpop.f32.mrb[27].mxu0  ;;  %v620_v26 = vpop.f32.mrb[27].mxu1  ;;  %v674_v29 = vmax.f32 %v498_v15, 0.0  ;;  %v706_v30 = vmax.f32 %v626_v16, 0.0 }
 0x111   :  { %v493_v27 = vadd.f32 %v1719_v34, %v492_v25  ;;  %v621_v28 = vadd.f32 %v1719_v34, %v620_v26  ;;  %v672_v33 = vmax.f32 %v490_v19, 0.0  ;;  %v704_v35 = vmax.f32 %v618_v20, 0.0 }
 0x112   :  { %v675_v31 = vmax.f32 %v501_v23, 0.0  ;;  %v707_v32 = vmax.f32 %v629_v24, 0.0 }
 0x113   :  { %v673_v36 = vmax.f32 %v493_v27, 0.0  ;;  %v705_v37 = vmax.f32 %v621_v28, 0.0 }
 0x114   :  { %v1299_v38 = vpack.c.bf16 %v675_v31, %v674_v29  ;;  %v1379_v39 = vpack.c.bf16 %v707_v32, %v706_v30 }
 0x115   :  { %v1294_v40 = vpack.c.bf16 %v673_v36, %v672_v33  ;;  %v1374_v41 = vpack.c.bf16 %v705_v37, %v704_v35  ;;  %v1490_v42 = vpop.f32.mrb[28].mxu0  ;;  %v1522_v43 = vpop.f32.mrb[28].mxu1 }
 0x116   :  { %1403 = vst [vmem:[%s1884_s3 + $0x68] sm:$0xff] %v1299_v38   ;;  %1419 = vst [vmem:[%s1884_s3 + $0xe8] sm:$0xff] %v1379_v39   ;;  %v514_v44 = vadd.f32 %v1490_v42, %v1719_v34  ;;  %v642_v45 = vadd.f32 %v1522_v43, %v1719_v34  ;;  %v505_v46 = vpop.f32.mrb[29].mxu0  ;;  %v633_v47 = vpop.f32.mrb[29].mxu1 }
 0x117   :  { %1402 = vst [vmem:[%s1884_s3 + $0x60] sm:$0xff] %v1294_v40   ;;  %1418 = vst [vmem:[%s1884_s3 + $0xe0] sm:$0xff] %v1374_v41   ;;  %v506_v48 = vadd.f32 %v1719_v34, %v505_v46  ;;  %v634_v49 = vadd.f32 %v1719_v34, %v633_v47  ;;  %v1491_v50 = vpop.f32.mrb[30].mxu0  ;;  %v1523_v51 = vpop.f32.mrb[30].mxu1 }
 0x118   :  { %v517_v52 = vadd.f32 %v1491_v50, %v1719_v34  ;;  %v645_v53 = vadd.f32 %v1523_v51, %v1719_v34  ;;  %v508_v54 = vpop.f32.mrb[31].mxu0  ;;  %v636_v55 = vpop.f32.mrb[31].mxu1  ;;  %v678_v58 = vmax.f32 %v514_v44, 0.0  ;;  %v710_v59 = vmax.f32 %v642_v45, 0.0 }
 0x119   :  { %v509_v56 = vadd.f32 %v1719_v34, %v508_v54  ;;  %v637_v57 = vadd.f32 %v1719_v34, %v636_v55  ;;  %v676_v62 = vmax.f32 %v506_v48, 0.0  ;;  %v708_v63 = vmax.f32 %v634_v49, 0.0 }
 0x11a   :  { %v679_v60 = vmax.f32 %v517_v52, 0.0  ;;  %v711_v61 = vmax.f32 %v645_v53, 0.0 }
 0x11b   :  { %v677_v0 = vmax.f32 %v509_v56, 0.0  ;;  %v709_v1 = vmax.f32 %v637_v57, 0.0 }
 0x11c   :  { %v1309_v2 = vpack.c.bf16 %v679_v60, %v678_v58  ;;  %v1389_v3 = vpack.c.bf16 %v711_v61, %v710_v59 }
 0x11d   :  { %v1304_v4 = vpack.c.bf16 %v677_v0, %v676_v62  ;;  %v1384_v5 = vpack.c.bf16 %v709_v1, %v708_v63 }
 0x11e   :  { %1405 = vst [vmem:[%s1884_s3 + $0x78] sm:$0xff] %v1309_v2   ;;  %1421 = vst [vmem:[%s1884_s3 + $0xf8] sm:$0xff] %v1389_v3  }
 0x11f   :  { %1404 = vst [vmem:[%s1884_s3 + $0x70] sm:$0xff] %v1304_v4   ;;  %1420 = vst [vmem:[%s1884_s3 + $0xf0] sm:$0xff] %v1384_v5  }

</bundles_post_ra>
